<compile_context>
chip_gen: v6e
topology: v6e:2x2x1
jax: 0.10.0
libtpu: 0.0.40
codegen_flags: <defaults>
</compile_context>

<pallas_src>
import math
import functools

import jax
import jax.numpy as jnp
from jax.experimental import pallas as pl
from jax.experimental.pallas import tpu as pltpu


# ---------------------------------------------------------------------------
# Pallas kernel: QKVAttention core (one grid step == one batch element).
# ---------------------------------------------------------------------------
def _attn_kernel(qkv_ref, o_ref, *, scale2):
    """qkv_ref: (1, 3, H, C, T) native-layout window; o_ref: (1, H, C, T)."""
    q = qkv_ref[0, 0]        # [H, C, T]  (input dtype -> MXU operand)
    k = qkv_ref[0, 1]        # [H, C, T]
    v = qkv_ref[0, 2]        # [H, C, T]

    # logits[h, t, s] = sum_c q[h, c, t] * k[h, c, s]  (contract channel axis)
    w = jax.lax.dot_general(
        q, k,
        dimension_numbers=(((1,), (1,)), ((0,), (0,))),
        preferred_element_type=jnp.float32)            # [H, T, T] f32
    # Fused scale: (q*s) . (k*s) == s^2 * (q . k).
    w = w * scale2

    # Softmax over the key axis, in f32 (matches torch's .float() softmax).
    w = w - jnp.max(w, axis=-1, keepdims=True)
    p = jnp.exp(w)
    denom = jnp.sum(p, axis=-1, keepdims=True)
    p = p * pl.reciprocal(denom, approx=True)          # EUP, not a VPU divide

    # out[h, c, t] = sum_s v[h, c, s] * p[h, t, s]
    out = jax.lax.dot_general(
        v, p.astype(v.dtype),
        dimension_numbers=(((2,), (2,)), ((0,), (0,))),
        preferred_element_type=jnp.float32)            # [H, C, T] f32
    o_ref[0] = out.astype(o_ref.dtype)


def qkv_attention(qkv: jax.Array, n_heads: int) -> jax.Array:
    """Pallas implementation of QKVAttention.forward.

    Args:
      qkv: [N, 3*H*C, T] array (same layout as the PyTorch module).
      n_heads: number of attention heads H.
    Returns:
      [N, H*C, T] array.
    """
    bs, width, length = qkv.shape
    assert width % (3 * n_heads) == 0
    ch = width // (3 * n_heads)
    scale2 = 1.0 / math.sqrt(ch)          # == (1 / ch**0.25) ** 2

    # Free (bitcast) reshape of the channel dim 3*H*C -> (3, H, C): no HBM pass.
    qkv5 = qkv.reshape(bs, 3, n_heads, ch, length)

    itemsize = jnp.dtype(qkv.dtype).itemsize
    cost = pl.CostEstimate(
        flops=4 * bs * n_heads * length * length * ch,      # two matmuls
        transcendentals=bs * n_heads * length * length,      # exp
        bytes_accessed=(qkv.size + bs * n_heads * ch * length) * itemsize)

    kernel = functools.partial(_attn_kernel, scale2=scale2)

    # Per-step VMEM: (3 inputs + 1 output) * H*C*T * itemsize * 2 buffers plus
    # the [H, T, T] f32 logits -- far below even v7x's 64 MiB for these shapes.
    out = pl.pallas_call(
        kernel,
        out_shape=jax.ShapeDtypeStruct((bs, n_heads, ch, length), qkv.dtype),
        grid_spec=pltpu.PrefetchScalarGridSpec(
            num_scalar_prefetch=0,
            grid=(bs,),                                      # >=2 => both v7x TCs
            in_specs=[pl.BlockSpec((1, 3, n_heads, ch, length),
                                   lambda n: (n, 0, 0, 0, 0))],
            out_specs=pl.BlockSpec((1, n_heads, ch, length),
                                   lambda n: (n, 0, 0, 0)),
        ),
        compiler_params=pltpu.CompilerParams(
            dimension_semantics=("parallel",)),
        cost_estimate=cost,
    )(qkv5)

    # Free (bitcast) reshape back to the module's [N, H*C, T] layout.
    return out.reshape(bs, n_heads * ch, length)


# ---------------------------------------------------------------------------
# Full AttentionPool2d forward (pooling / pos-embed / 1x1 convs around the
# Pallas attention kernel).
# ---------------------------------------------------------------------------
def attention_pool_2d(x, params, num_heads, attention_fn=qkv_attention):
    """AttentionPool2d.forward.  x: [B, embed_dim, *spatial]."""
    b, c = x.shape[0], x.shape[1]
    x = x.reshape(b, c, -1)                                          # [B, C, S]
    x = jnp.concatenate([jnp.mean(x, axis=-1, keepdims=True), x], axis=-1)
    x = x + params["positional_embedding"][None].astype(x.dtype)     # [B, C, T]
    # 1x1 conv1d projections == channel matmuls; these thin, memory-bound ops
    # are left to XLA on purpose -- the attention core is the Pallas kernel.
    x = jnp.einsum('oc,bct->bot', params["qkv_w"], x) \
        + params["qkv_b"][None, :, None]                             # [B, 3C, T]
    x = attention_fn(x, num_heads)                                   # [B, C, T]
    x = jnp.einsum('oc,bct->bot', params["c_w"], x) \
        + params["c_b"][None, :, None]                               # [B, O, T]
    return x[:, :, 0]                                                # [B, O]


# ---------------------------------------------------------------------------
# Pure-JAX references mirroring the PyTorch forward exactly.
# ---------------------------------------------------------------------------
def _qkv_attention_ref(qkv, n_heads):
    bs, width, length = qkv.shape
    ch = width // (3 * n_heads)
    q, k, v = jnp.split(qkv, 3, axis=1)
    scale = 1.0 / math.sqrt(math.sqrt(ch))
    qr = (q * scale).reshape(bs * n_heads, ch, length)
    kr = (k * scale).reshape(bs * n_heads, ch, length)
    vr = v.reshape(bs * n_heads, ch, length)
    w = jnp.einsum('bct,bcs->bts', qr, kr)
    w = jax.nn.softmax(w.astype(jnp.float32), axis=-1).astype(w.dtype)
    a = jnp.einsum('bts,bcs->bct', w, vr)
    return a.reshape(bs, -1, length)


def _attention_pool_ref(x, params, num_heads):
    return attention_pool_2d(x, params, num_heads, attention_fn=_qkv_attention_ref)


if __name__ == "__main__":
    # Small shapes consistent with the module:
    #   batch N=2, embed_dim=32, spacial_dim=4 (T = 4*4 + 1 = 17),
    #   num_head_channels=16 => H=2 heads, output_dim=32.
    N, embed_dim, spacial_dim, num_head_channels, output_dim = 2, 32, 4, 16, 32
    H = embed_dim // num_head_channels
    T = spacial_dim ** 2 + 1

    key = jax.random.PRNGKey(0)
    ks = jax.random.split(key, 6)
    x = jax.random.normal(ks[0], (N, embed_dim, spacial_dim, spacial_dim),
                          dtype=jnp.float32)
    params = dict(
        positional_embedding=jax.random.normal(ks[1], (embed_dim, T),
                                               jnp.float32) / embed_dim ** 0.5,
        qkv_w=jax.random.normal(ks[2], (3 * embed_dim, embed_dim),
                                jnp.float32) / embed_dim ** 0.5,
        qkv_b=jnp.zeros((3 * embed_dim,), jnp.float32),
        c_w=jax.random.normal(ks[3], (output_dim, embed_dim),
                              jnp.float32) / embed_dim ** 0.5,
        c_b=jnp.zeros((output_dim,), jnp.float32),
    )

    # Tolerances: pl.reciprocal(approx=True) loosens exact parity slightly
    # (per review); 5e-3 is a >10x safety margin for f32 inputs.
    ATOL = RTOL = 5e-3

    # 1) QKVAttention kernel alone vs. reference.
    qkv = jax.random.normal(ks[4], (N, 3 * embed_dim, T), dtype=jnp.float32)
    attn = jax.block_until_ready(qkv_attention(qkv, H))
    attn_ref = _qkv_attention_ref(qkv, H)
    assert attn.shape == (N, embed_dim, T), attn.shape
    assert jnp.allclose(attn, attn_ref, atol=ATOL, rtol=RTOL), \
        "qkv_attention mismatch vs reference"

    # 2) Full AttentionPool2d forward vs. reference.
    out = jax.block_until_ready(attention_pool_2d(x, params, H))
    out_ref = _attention_pool_ref(x, params, H)
    assert out.shape == (N, output_dim), out.shape
    assert jnp.allclose(out, out_ref, atol=ATOL, rtol=RTOL), \
        "attention_pool_2d mismatch vs reference"

    print("KERNEL_OK")
</pallas_src>

<mosaic_0001>
module attributes {stable_mosaic.version = 11 : i64} {
  func.func @_attn_kernel(%arg0: i32, %arg1: memref<1x3x2x16x17xf32, #tpu.memory_space<vmem>>, %arg2: memref<1x2x16x17xf32, #tpu.memory_space<vmem>>) attributes {dimension_semantics = [#tpu.dimension_semantics<parallel>], iteration_bounds = array<i64: 2>, scalar_prefetch = 0 : i64, scratch_operands = 0 : i64, tpu.core_type = #tpu.core_type<tc>, window_params = [{transform_indices = @transform_0, window_bounds = array<i64: 1, 3, 2, 16, 17>}, {transform_indices = @transform_1, window_bounds = array<i64: 1, 2, 16, 17>}]} {
    %c0 = arith.constant 0 : index
    %c0_0 = arith.constant 0 : index
    %c0_1 = arith.constant 0 : index
    %c0_2 = arith.constant 0 : index
    %c0_3 = arith.constant 0 : index
    %0 = vector.load %arg1[%c0, %c0_0, %c0_1, %c0_2, %c0_3] : memref<1x3x2x16x17xf32, #tpu.memory_space<vmem>>, vector<1x1x2x16x17xf32>
    %1 = vector.shape_cast %0 : vector<1x1x2x16x17xf32> to vector<2x16x17xf32>
    %c0_4 = arith.constant 0 : index
    %c1 = arith.constant 1 : index
    %c0_5 = arith.constant 0 : index
    %c0_6 = arith.constant 0 : index
    %c0_7 = arith.constant 0 : index
    %2 = vector.load %arg1[%c0_4, %c1, %c0_5, %c0_6, %c0_7] : memref<1x3x2x16x17xf32, #tpu.memory_space<vmem>>, vector<1x1x2x16x17xf32>
    %3 = vector.shape_cast %2 : vector<1x1x2x16x17xf32> to vector<2x16x17xf32>
    %c0_8 = arith.constant 0 : index
    %c2 = arith.constant 2 : index
    %c0_9 = arith.constant 0 : index
    %c0_10 = arith.constant 0 : index
    %c0_11 = arith.constant 0 : index
    %4 = vector.load %arg1[%c0_8, %c2, %c0_9, %c0_10, %c0_11] : memref<1x3x2x16x17xf32, #tpu.memory_space<vmem>>, vector<1x1x2x16x17xf32>
    %5 = vector.shape_cast %4 : vector<1x1x2x16x17xf32> to vector<2x16x17xf32>
    %cst = arith.constant dense<0.000000e+00> : vector<2x17x17xf32>
    %6 = tpu.matmul %1, %3, %cst {dimension_numbers = #tpu.dot_dimension_numbers<[1], [1], [2], [2], [0, 0, 0, 2, 1, 2], [0], [0]>} : vector<2x16x17xf32>, vector<2x16x17xf32>, vector<2x17x17xf32> -> vector<2x17x17xf32>
    %cst_12 = arith.constant 2.500000e-01 : f32
    %7 = vector.broadcast %cst_12 : f32 to vector<2x17x17xf32>
    %8 = arith.mulf %6, %7 : vector<2x17x17xf32>
    %cst_13 = arith.constant dense<0xFF800000> : vector<2x17xf32>
    %9 = vector.multi_reduction <maximumf>, %8, %cst_13 [2] : vector<2x17x17xf32> to vector<2x17xf32>
    %10 = vector.shape_cast %9 : vector<2x17xf32> to vector<2x17x1xf32>
    %11 = vector.broadcast %10 : vector<2x17x1xf32> to vector<2x17x17xf32>
    %12 = arith.subf %8, %11 : vector<2x17x17xf32>
    %13 = math.exp %12 : vector<2x17x17xf32>
    %cst_14 = arith.constant dense<0.000000e+00> : vector<2x17xf32>
    %14 = vector.multi_reduction <add>, %13, %cst_14 [2] : vector<2x17x17xf32> to vector<2x17xf32>
    %15 = vector.shape_cast %14 : vector<2x17xf32> to vector<2x17x1xf32>
    %16 = tpu.reciprocal %15 {approx = true} : vector<2x17x1xf32> -> vector<2x17x1xf32>
    %17 = vector.broadcast %16 : vector<2x17x1xf32> to vector<2x17x17xf32>
    %18 = arith.mulf %13, %17 : vector<2x17x17xf32>
    %cst_15 = arith.constant dense<0.000000e+00> : vector<2x16x17xf32>
    %19 = tpu.matmul %5, %18, %cst_15 {dimension_numbers = #tpu.dot_dimension_numbers<[2], [2], [1], [1], [0, 0, 0, 1, 1, 1], [0], [0]>} : vector<2x16x17xf32>, vector<2x17x17xf32>, vector<2x16x17xf32> -> vector<2x16x17xf32>
    %c0_16 = arith.constant 0 : index
    %c0_17 = arith.constant 0 : index
    %c0_18 = arith.constant 0 : index
    %c0_19 = arith.constant 0 : index
    %20 = vector.load %arg2[%c0_16, %c0_17, %c0_18, %c0_19] : memref<1x2x16x17xf32, #tpu.memory_space<vmem>>, vector<1x2x16x17xf32>
    %21 = vector.shape_cast %20 : vector<1x2x16x17xf32> to vector<2x16x17xf32>
    %22 = vector.shape_cast %19 : vector<2x16x17xf32> to vector<1x2x16x17xf32>
    tpu.vector_store %arg2[%c0_16, %c0_17, %c0_18, %c0_19], %22 {strides = array<i32>} : memref<1x2x16x17xf32, #tpu.memory_space<vmem>>, vector<1x2x16x17xf32>,
    return
  }
  func.func @transform_0(%arg0: i32) -> (i32, i32, i32, i32, i32) {
    %c0_i32 = arith.constant 0 : i32
    %c0_i32_0 = arith.constant 0 : i32
    %c0_i32_1 = arith.constant 0 : i32
    %c0_i32_2 = arith.constant 0 : i32
    %c0_i32_3 = arith.constant 0 : i32
    return %arg0, %c0_i32, %c0_i32_0, %c0_i32_1, %c0_i32_2 : i32, i32, i32, i32, i32
  }
  func.func @transform_1(%arg0: i32) -> (i32, i32, i32, i32) {
    %c0_i32 = arith.constant 0 : i32
    %c0_i32_0 = arith.constant 0 : i32
    %c0_i32_1 = arith.constant 0 : i32
    %c0_i32_2 = arith.constant 0 : i32
    return %arg0, %c0_i32, %c0_i32_0, %c0_i32_1 : i32, i32, i32, i32
  }
}

</mosaic_0001>

<bundles_post_ra>
// kernel: tpu_custom_call.1
= control target key start
LH: loop header
LB: loop body
LE: loop exit
PB: predicated region body
PF: predicated region fallthrough
CT: control target
= control target key end

     0   :  { %6 = vsyncpa [#allocation3], 0  ;;  %s1235_s0 = inlined_call_operand.hbm [shape: f32[2,3,2,16,17], index: 0, kind: input, shape index: {}]   ;;  %s1236_s1 = inlined_call_operand.hbm [shape: f32[2,2,16,17], index: 1, kind: output, shape index: {}]  }
   0x1   :  { %8 = vsyncpa [#allocation3 + $0x1], 0 }
   0x2   :  { %9 = vsyncpa [#allocation4], 0 }
   0x3   :  { %11 = vsyncpa [#allocation4 + $0x1], 0  ;;  %s1028_s6 = smov 0   ;;  %s1030_s7 = smov 0  }
   0x4   :  { %s1032_s8 = smov 0   ;;  %s1034_s9 = smov 0  }
   0x5 LB: > { %s1049_s10 = sadd.s32 4294967295, %s1008_s9   ;;  %s737_s11 = sadd.s32 4294967294, %s1008_s9   ;;  %s1008_s9 = sphi %s1034_s9, %s1250_s9   ;;  %s1004_s8 = sphi %s1032_s8, %s1249_s8   ;;  %s1000_s7 = sphi %s1030_s7, %s1248_s7   ;;  %s996_s6 = sphi %s1028_s6, %s1247_s6  }
   0x6   : > { %s1053_s12 = sadd.s32 1, %s1008_s9   ;;  %s24_s13 = sadd.s32 1, %s1004_s8 }
   0x7   : > { %s21_s14 = ssub.s32 %s1008_s9, %s1053_s12  ;;  %p31_p0 = scmp.ne.s32.totalorder %s1004_s8, %s1000_s7 }
   0x8   : > { %p22_p1 = scmp.eq.s32.totalorder %s21_s14, 0  ;;  %p32_p2 = scmp.eq.s32.totalorder %s1008_s9, 0 }
   0x9   : > { %p37_p3 = scmp.ne.s32.totalorder %s1000_s7, %s996_s6  ;;  %p38_p4 = scmp.eq.s32.totalorder %s1049_s10, 0 }
   0xa   : > { %s1065_s15 = scalar_select %p22_p1, %s1004_s8, %s24_s13  }
   0xb   : > { %p33_p5 = por %p32_p2, %p31_p0  ;;  %p1067_p6 = por %p38_p4, %p37_p3 }
   0xc   : > { %p61_p7 = scmp.eq.s32.totalorder %s1049_s10, 1  ;;  %p67_p8 = scmp.eq.s32.totalorder %s737_s11, 1 }
   0xd   : > { %s1239_s16 = scalar_select %p1067_p6, 1, 0 }
   0xe   : > { %p852_p10 = scmp.lt.s32.totalorder %s1008_s9, 2  ;;  %p1074_p11 = por %p61_p7, %p31_p0 }
   0xf   : > { %p1078_p12 = por %p67_p8, %p37_p3  ;;  %s87_s19 = sand.u32 1, %s1004_s8  }
  0x10   : > { %s1240_s17 = scalar_select %p1074_p11, 1, 0 }
  0x11   : > { %s1241_s18 = scalar_select %p1078_p12, 1, 0 }
  0x12   : > { %s838_s20 = smul.u32 1536, %s1008_s9  ;;  %p1089_p13 = pnand %p852_p10, %p33_p5 }
  0x13   : > { %s837_s21 = smul.u32 96, %s87_s19  ;;  %s1095_s28 = scalar_lea.sflag [#allocation3], %s87_s19 }
  0x14   : > { %s1087_s24 = scalar_lea.hbm %s1235_s0, %s838_s20  ;;  %p918_p1 = pneg %p1089_p13 }
  0x15   : > { %s91_s26 = scalar_lea.vmem [#allocation2], %s837_s21  ;;  %s916_s29 = scalar_lea.hbm %s1087_s24, 1536 }
  0x16   : > { %s98_s27 = sshll.u32 %s91_s26, 4  ;;  %p917_p0 = scmp.ne.s32.totalorder %s1087_s24, %s916_s29  ;;  %s1093_s27 = int_to_ptr.vmem [resolvable:$true] %s98_s27 }
  0x17   : > { %s921_s3 = scalar_lea.hbm %s1235_s0, 3072  ;;  %p922_p4 = scmp.lt.s32.totalorder %s1087_s24, %s1235_s0 }
  0x18   : > { %p919_p2 = pnand %p918_p1, %p917_p0  ;;  %p923_p5 = scmp.lt.s32.totalorder %s921_s3, %s916_s29 }
  0x1a   : > { %p920_p3 = pneg %p919_p2  ;;  %p924_p7 = por %p923_p5, %p922_p4 }
  0x1c   : > { %p925_p8 = pnand %p924_p7, %p920_p3 }
  0x1e   : > { %928 = shalt.err (!%p925_p8)
}
  0x1f   : > { %s929_s11 = scalar_lea.vmem %s1093_s27, 1536  ;;  %s1010_s13 = smov [#allocation2]  }
  0x20   : > { %p930_p10 = scmp.ne.s32.totalorder %s1093_s27, %s929_s11  ;;  %s934_s14 = sshll.u32 %s1010_s13, 4  ;;  %s935_s14 = int_to_ptr.vmem [resolvable:$false] %s934_s14 }
  0x21   : > { %s936_s19 = scalar_lea.vmem %s935_s14, 3072  ;;  %p937_p2 = scmp.lt.s32.totalorder %s1093_s27, %s935_s14 }
  0x22   : > { %p932_p9 = pnand %p930_p10, %p918_p1  ;;  %p938_p12 = scmp.lt.s32.totalorder %s936_s19, %s929_s11 }
  0x24   : > { %p933_p0 = pneg %p932_p9  ;;  %p939_p11 = por %p938_p12, %p937_p2 }
  0x26   : > { %p940_p6 = pnand %p939_p11, %p933_p0 }
  0x28   : > { %943 = shalt.err (!%p940_p6)
}
  0x29   : > { %s1011_s20 = smov 128   ;;  %s1012_s21 = smov 8  }
  0x2a   : > { %847 = dma.hbm_to_vmem [thread:$0]  (!%p1089_p13), %s1087_s24, 1536, %s1093_s27, %s1095_s28, %s1011_s20, %s1011_s20, %s1012_s21  }
  0x2b   : > { %p741_p9 = scmp.ge.s32.totalorder %s1008_s9, 1  ;;  %p106_p1 = scmp.lt.s32.totalorder %s1008_s9, 3 }
  0x2d   : > { %p107_p3 = pnand %p741_p9, %p106_p1 }
  0x2e   : > { %s1119_s22 = sand.u32 (!%p107_p3), 1, %s1000_s7   ;;  %p1243_p6 = scmp.ne.s32.totalorder (!%p107_p3), %s1239_s16, 0 }
  0x2f   : > { %110 = sbr.rel (%p107_p3) target bundleno = 918 (0x396), region = 24  ;;  %s113_s26 = scalar_lea.sflag (!%p107_p3), [#allocation3], %s1119_s22 }
  0x30   : > { %s839_s23 = smul.u32 (!%p107_p3), 96, %s1119_s22 }
  0x32   : > { %s1123_s29 = scalar_lea.vmem (!%p107_p3), [#allocation2], %s839_s23 }
  0x34   : > { %987 = dma.done.wait (%p1243_p6), %s113_s26, 1536  }
  0x35   : > { %989 = vsyncadd (%p1243_p6), %s113_s26, 4294965760  ;;  %v1013_v0 = vmov 0.0   ;;  %vm1014_vm0 = vmmov 0   ;;  %v137_v1 = vld [vmem:[%s1123_s29 + $0x10] sm:$0xff]  ;;  %v135_v2 = vld [vmem:[%s1123_s29] sm:$0xff]  ;;  %vm181_vm1 = vcmask 130048  }
  0x36   : > { %793 = vmatprep.subr.mxu0 %v1013_v0  ;;  %806 = vmatprep.subr.mxu1 %v1013_v0  ;;  %v138_v3 = vld [vmem:[%s1123_s29 + $0x18] sm:$0xff]  ;;  %v744_v4 = vld [vmem:[%s1123_s29 + $0x28] sm:$0xff]  ;;  %v743_v7 = vld [vmem:[%s1123_s29 + $0x20] sm:$0xff]  ;;  %vm398_vm2 = vcmask 138240   ;;  %vm405_vm3 = vcmask 131072   ;;  %s742_s16 = sshll.u32 %s1119_s22, 5 }
  0x37   : > { %797 = vmatprep.mubr.msk.f32.mxu0 %vm1014_vm0, %v1013_v0  ;;  %810 = vmatprep.mubr.msk.f32.mxu1 %vm1014_vm0, %v1013_v0  ;;  %v746_v5 = vld [vmem:[%s1123_s29 + $0x38] sm:$0xff]  ;;  %v136_v6 = vld [vmem:[%s1123_s29 + $0x8] sm:$0xff]  ;;  %v745_v8 = vld [vmem:[%s1123_s29 + $0x30] sm:$0xff]  ;;  %s134_s24 = scalar_lea.vmem [#allocation5], %s742_s16  ;;  %s772_s27 = sshll.u32 %s1049_s10, 9 }
  0x38   : > { %271 = vxpose.xlu1.b32.start [1/2] (short) (narrow) %v137_v1, 24  ;;  %149 = vxpose.xlu0.b32.start [1/2] (short) (narrow) %v135_v2, 24  ;;  %s664_s25 = sshll.u32 %s134_s24, 4  ;;  %s1189_s2 = scalar_lea.hbm %s1236_s1, %s772_s27  ;;  %s1183_s25 = int_to_ptr.vmem [resolvable:$true] %s664_s25 }
  0x39   : > { %794 = vmatpush3.msra.mxu0 %v744_v4  ;;  %807 = vmatpush3.msra.mxu1 %v746_v5  ;;  %v747_v5 = vld [vmem:[%s1123_s29 + $0x40] sm:$0xff]  ;;  %s651_s10 = scalar_lea.sflag [#allocation4], %s1119_s22  ;;  %s944_s3 = scalar_lea.vmem %s1183_s25, 512 }
  0x3a   : > { %795 = vmatprep.subr.mxu0 %v1013_v0  ;;  %808 = vmatprep.subr.mxu1 %v1013_v0  ;;  %p945_p11 = scmp.ne.s32.totalorder %s1183_s25, %s944_s3  ;;  %p1244_p12 = scmp.ne.s32.totalorder %s1240_s17, 0 }
  0x3b   : > { %796 = vmatpush3.msra.mxu0 %v743_v7  ;;  %809 = vmatpush3.msra.mxu1 %v745_v8  ;;  %s1015_s4 = smov [#allocation5]  }
  0x3c   : > { %272 = vxpose.xlu1.b32.end [2/2] (short) (narrow) %v138_v3, 24  ;;  %150 = vxpose.xlu0.b32.end [2/2] (short) (narrow) %v136_v6, 24  ;;  %v749_v6 = vld [vmem:[%s1123_s29 + $0x50] sm:$0xff]  ;;  %p946_p13 = pnand %p945_p11, %p1244_p12  ;;  %s948_s5 = sshll.u32 %s1015_s4, 4  ;;  %s949_s5 = int_to_ptr.vmem [resolvable:$false] %s948_s5 }
  0x3d   : > { %s950_s11 = scalar_lea.vmem %s949_s5, 1024  ;;  %p951_p5 = scmp.lt.s32.totalorder %s1183_s25, %s949_s5 }
  0x3e   : > { %p947_p4 = pneg %p946_p13  ;;  %p952_p7 = scmp.lt.s32.totalorder %s950_s11, %s944_s3 }
  0x40   : > { %p953_p8 = por %p952_p7, %p951_p5 }
  0x42   : > { %p954_p10 = pnand %p953_p8, %p947_p4 }
  0xb4   : > { %v287_v9 = vpop.trf.xlu1  ;;  %v165_v10 = vpop.trf.xlu0 }
  0xb5   : > { %798 = vmatmul.mubr.msk.f32.vlgmr.msra.gmra.mxu0 %vm181_vm1, %v165_v10  ;;  %811 = vmatmul.mubr.msk.f32.vlgmr.msra.gmra.mxu1 %vm181_vm1, %v287_v9 }
  0xb6   : > { %813 = vmatprep.mubr.msk.f32.mxu1 %vm1014_vm0, %v1013_v0  ;;  %800 = vmatprep.mubr.msk.f32.mxu0 %vm1014_vm0, %v1013_v0 }
  0xb8   : > { %v288_v11 = vpop.trf.xlu1  ;;  %v166_v12 = vpop.trf.xlu0 }
  0xb9   : > { %801 = vmatmul.mubr.msk.f32.gmra.mxu0 %vm181_vm1, %v166_v12  ;;  %814 = vmatmul.mubr.msk.f32.gmra.mxu1 %vm181_vm1, %v288_v11 }
  0xba   : > { %816 = vmatprep.mubr.msk.f32.mxu1 %vm1014_vm0, %v1013_v0  ;;  %803 = vmatprep.mubr.msk.f32.mxu0 %vm1014_vm0, %v1013_v0 }
  0xbc   : > { %v289_v13 = vpop.trf.xlu1  ;;  %v167_v14 = vpop.trf.xlu0 }
  0xbd   : > { %804 = vmatmul.mubr.msk.f32.gmra.mxu0 %vm181_vm1, %v167_v14  ;;  %817 = vmatmul.mubr.msk.f32.gmra.mxu1 %vm181_vm1, %v289_v13 }
  0xbe   : > { %825 = vmatprep.mubr.msk.f32.mxu0 %vm398_vm2, %v747_v5  ;;  %834 = vmatprep.mubr.msk.f32.mxu1 %vm398_vm2, %v749_v6 }
 0x175   : > { %v257_v15 = vpop.f32.mrf.mxu0  ;;  %v378_v16 = vpop.f32.mrf.mxu1 }
 0x176   : > { %v392_v31 = vmul.f32 0.25, %v257_v15  ;;  %v395_v35 = vmul.f32 0.25, %v378_v16 }
 0x177   : > { %v799_v17 = vpop.f32.mrf.mxu0  ;;  %v812_v18 = vpop.f32.mrf.mxu1 }
 0x178   : > { %v399_v37 = vsel %vm398_vm2, %v392_v31, -inf  ;;  %v409_v38 = vsel %vm398_vm2, %v395_v35, -inf }
 0x179   : > { %v262_v19 = vpop.f32.mrf.mxu0  ;;  %v383_v20 = vpop.f32.mrf.mxu1 }
 0x17a   : > { %v393_v21 = vmul.f32 0.25, %v262_v19  ;;  %v396_v32 = vmul.f32 0.25, %v383_v20 }
 0x17b   : > { %v802_v22 = vpop.f32.mrf.mxu0  ;;  %v815_v23 = vpop.f32.mrf.mxu1 }
 0x17c   : > { %v402_v24 = vsel %vm398_vm2, %v393_v21, -inf  ;;  %v412_v36 = vsel %vm398_vm2, %v396_v32, -inf }
 0x17d   : > { %v388_v25 = vpop.f32.mrf.mxu1  ;;  %403 = vmax.xlane.f32.xlu1 %v402_v24  ;;  %v267_v26 = vpop.f32.mrf.mxu0 }
 0x17e   : > { %v397_v27 = vmul.f32 0.25, %v388_v25  ;;  %v394_v28 = vmul.f32 0.25, %v267_v26  ;;  %v750_v25 = vld [vmem:[%s1123_s29 + $0x58] sm:$0xff]  ;;  %v748_v26 = vld [vmem:[%s1123_s29 + $0x48] sm:$0xff] }
 0x17f   : > { %v805_v29 = vpop.f32.mrf.mxu0  ;;  %v818_v30 = vpop.f32.mrf.mxu1 }
 0x180   : > { %v415_v33 = vsel %vm405_vm3, %v397_v27, -inf  ;;  %v406_v34 = vsel %vm405_vm3, %v394_v28, -inf }
 0x181   : > { %416 = vmax.xlane.f32.xlu1 %v415_v33  ;;  %407 = vmax.xlane.f32.xlu0 %v406_v34 }
 0x185   : > { %413 = vmax.xlane.f32.xlu1 %v412_v36  ;;  %400 = vmax.xlane.f32.xlu0 %v399_v37 }
 0x189   : > { %410 = vmax.xlane.f32.xlu1 %v409_v38 }
 0x206   : > { %v404_v39 = vpop.xlane.xlu1 %403 }
 0x207   : > { %v419_v40 = vsub.f32 %v393_v21, %v404_v39 }
 0x209   : > { %v426_v47 = vmul.f32 1.442695, %v419_v40 }
 0x20a   : > { %v417_v41 = vpop.xlane.xlu1 %416  ;;  %v408_v42 = vpop.xlane.xlu0 %407 }
 0x20b   : > { %v423_v43 = vsub.f32 %v397_v27, %v417_v41  ;;  %v420_v44 = vsub.f32 %v394_v28, %v408_v42 }
 0x20d   : > { %v434_v45 = vmul.f32 1.442695, %v423_v43  ;;  %v428_v46 = vmul.f32 1.442695, %v420_v44 }
 0x20e   : > { %v414_v48 = vpop.xlane.xlu1 %413  ;;  %v401_v49 = vpop.xlane.xlu0 %400 }
 0x20f   : > { %892 = vpow2.f32 %v434_v45  ;;  %v422_v50 = vsub.f32 %v396_v32, %v414_v48  ;;  %v418_v51 = vsub.f32 %v392_v31, %v401_v49 }
 0x210   : > { %894 = vpow2.f32 %v428_v46 }
 0x211   : > { %v432_v52 = vmul.f32 1.442695, %v422_v50  ;;  %896 = vpow2.f32 %v426_v47  ;;  %v424_v53 = vmul.f32 1.442695, %v418_v51 }
 0x212   : > { %v411_v54 = vpop.xlane.xlu1 %410 }
 0x213   : > { %898 = vpow2.f32 %v432_v52  ;;  %v421_v55 = vsub.f32 %v395_v35, %v411_v54 }
 0x214   : > { %900 = vpow2.f32 %v424_v53 }
 0x215   : > { %v430_v56 = vmul.f32 1.442695, %v421_v55 }
 0x217   : > { %902 = vpow2.f32 %v430_v56 }
 0x21c   : > { %v893_v57 = vpop.eup %892 }
 0x21d   : > { %v895_v58 = vpop.eup %894  ;;  %v451_v59 = vsel %vm405_vm3, %v893_v57, 0.0 }
 0x21e   : > { %452 = vadd.xlane.f32.xlu1 %v451_v59  ;;  %v442_v60 = vsel %vm405_vm3, %v895_v58, 0.0  ;;  %v897_v61 = vpop.eup %896 }
 0x21f   : > { %443 = vadd.xlane.f32.xlu0 %v442_v60  ;;  %v439_v0 = vsel %vm398_vm2, %v897_v61, 0.0 }
 0x220   : > { %v899_v62 = vpop.eup %898 }
 0x221   : > { %v448_v63 = vsel %vm398_vm2, %v899_v62, 0.0  ;;  %v901_v1 = vpop.eup %900 }
 0x222   : > { %449 = vadd.xlane.f32.xlu1 %v448_v63  ;;  %v436_v4 = vsel %vm398_vm2, %v901_v1, 0.0 }
 0x223   : > { %440 = vadd.xlane.f32.xlu0 %v439_v0 }
 0x224   : > { %v903_v2 = vpop.eup %902 }
 0x225   : > { %v445_v3 = vsel %vm398_vm2, %v903_v2, 0.0 }
 0x226   : > { %446 = vadd.xlane.f32.xlu1 %v445_v3 }
 0x227   : > { %437 = vadd.xlane.f32.xlu0 %v436_v4 }
 0x2a7   : > { %v453_v7 = vpop.xlane.xlu1 %452 }
 0x2a8   : > { %904 = vrcp.f32 %v453_v7  ;;  %v444_v8 = vpop.xlane.xlu0 %443 }
 0x2a9   : > { %906 = vrcp.f32 %v444_v8 }
 0x2ab   : > { %v450_v9 = vpop.xlane.xlu1 %449 }
 0x2ac   : > { %908 = vrcp.f32 %v450_v9  ;;  %v441_v10 = vpop.xlane.xlu0 %440 }
 0x2ad   : > { %910 = vrcp.f32 %v441_v10 }
 0x2af   : > { %v447_v11 = vpop.xlane.xlu1 %446 }
 0x2b0   : > { %912 = vrcp.f32 %v447_v11  ;;  %v438_v12 = vpop.xlane.xlu0 %437 }
 0x2b1   : > { %914 = vrcp.f32 %v438_v12 }
 0x2b5   : > { %v905_v13 = vpop.eup %904 }
 0x2b6   : > { %v907_v14 = vpop.eup %906  ;;  %v465_v15 = vmul.f32 %v905_v13, %v893_v57 }
 0x2b7   : > { %v462_v16 = vmul.f32 %v907_v14, %v895_v58 }
 0x2b8   : > { %828 = vmatprep.subr.msk.mxu1 %vm398_vm2, %v465_v15 }
 0x2b9   : > { %v909_v17 = vpop.eup %908  ;;  %819 = vmatprep.subr.msk.mxu0 %vm398_vm2, %v462_v16  ;;  %829 = vmatpush3.xpose.msk.msra.mxu1 %vm398_vm2, %v465_v15 }
 0x2ba   : > { %v911_v18 = vpop.eup %910  ;;  %820 = vmatpush3.xpose.msk.msra.mxu0 %vm398_vm2, %v462_v16  ;;  %v464_v19 = vmul.f32 %v909_v17, %v899_v62 }
 0x2bb   : > { %v461_v20 = vmul.f32 %v911_v18, %v897_v61 }
 0x2bc   : > { %830 = vmatprep.subr.msk.mxu1 %vm398_vm2, %v464_v19 }
 0x2bd   : > { %v913_v21 = vpop.eup %912  ;;  %821 = vmatprep.subr.msk.mxu0 %vm398_vm2, %v461_v20  ;;  %831 = vmatpush3.xpose.msk.msra.mxu1 %vm398_vm2, %v464_v19 }
 0x2be   : > { %v915_v22 = vpop.eup %914  ;;  %822 = vmatpush3.xpose.msk.msra.mxu0 %vm398_vm2, %v461_v20  ;;  %v463_v23 = vmul.f32 %v913_v21, %v903_v2 }
 0x2bf   : > { %v460_v24 = vmul.f32 %v915_v22, %v901_v1 }
 0x2c0   : > { %832 = vmatprep.subr.msk.mxu1 %vm398_vm2, %v463_v23 }
 0x2c1   : > { %823 = vmatprep.subr.msk.mxu0 %vm398_vm2, %v460_v24  ;;  %833 = vmatpush3.xpose.msk.msra.mxu1 %vm398_vm2, %v463_v23 }
 0x2c2   : > { %824 = vmatpush3.xpose.msk.msra.mxu0 %vm398_vm2, %v460_v24 }
 0x2c4   : > { %835 = vmatmul.mubr.msk.f32.vlgmr.msra.gmra.mxu1 %vm398_vm2, %v750_v25 }
 0x2c5   : > { %826 = vmatmul.mubr.msk.f32.vlgmr.msra.gmra.mxu0 %vm398_vm2, %v748_v26 }
 0x384   : > { %v836_v27 = vpop.f32.mrf.mxu1 }
 0x385   : > { %v827_v28 = vpop.f32.mrf.mxu0  ;;  %649 = vst.msk [vmem:[%s134_s24 + $0x18] sm:$0xff] %vm398_vm2, %v836_v27 }
 0x386   : > { %647 = vst.msk [vmem:[%s134_s24 + $0x8] sm:$0xff] %vm398_vm2, %v827_v28  ;;  %v637_v29 = vpop.f32.mrf.mxu1 }
 0x387   : > { %v547_v30 = vpop.f32.mrf.mxu0  ;;  %648 = vst.msk [vmem:[%s134_s24 + $0x10] sm:$0xff] %vm398_vm2, %v637_v29 }
 0x388   : > { %646 = vst.msk [vmem:[%s134_s24] sm:$0xff] %vm398_vm2, %v547_v30 }
 0x389   : > { %957 = shalt.err (!%p954_p10)
}
 0x38a   : > { %s958_s13 = scalar_lea.hbm %s1189_s2, 512  ;;  %s962_s20 = scalar_lea.hbm %s1236_s1, 1024 }
 0x38b   : > { %p959_p0 = scmp.ne.s32.totalorder %s1189_s2, %s958_s13  ;;  %p963_p1 = scmp.lt.s32.totalorder %s1189_s2, %s1236_s1 }
 0x38c   : > { %p964_p3 = scmp.lt.s32.totalorder %s962_s20, %s958_s13 }
 0x38d   : > { %p960_p2 = pnand %p959_p0, %p1244_p12 }
 0x38e   : > { %p965_p6 = por %p964_p3, %p963_p1 }
 0x38f   : > { %p961_p9 = pneg %p960_p2 }
 0x391   : > { %p966_p11 = pnand %p965_p6, %p961_p9 }
 0x393   : > { %969 = shalt.err (!%p966_p11)
}
 0x394   : > { %s1016_s26 = smov 128   ;;  %s1017_s29 = smov 8  }
 0x395   : > { %842 = dma.vmem_to_hbm [thread:$0]  (%p1244_p12), %s1183_s25, 512, %s1189_s2, %s651_s10, %s1016_s26, %s1016_s26, %s1017_s29  }
 0x396 PF: > { %s679_s16 = sand.u32 1, %s996_s6   ;;  %p1245_p13 = scmp.ne.s32.totalorder %s1241_s18, 0 }
 0x397   : > { %p1246_p4 = scmp.ge.s32.totalorder %s1008_s9, 2  ;;  %s680_s24 = scalar_lea.sflag [#allocation4], %s679_s16 }
 0x399   : > { %p849_p5 = pnand %p1246_p4, %p1245_p13 }
 0x39b   : > { %p850_p7 = pneg %p849_p5 }
 0x39d   : > { %991 = dma.done.wait (%p850_p7), %s680_s24, 512  }
 0x39e   : > { %993 = vsyncadd (%p850_p7), %s680_s24, 4294966784  ;;  %p14_p8 = scmp.ge.s32.totalorder %s1053_s12, 4   ;;  %s1247_s6 = smov %s1000_s7 }
 0x39f   : > { %s1248_s7 = smov %s1004_s8  ;;  %s1249_s8 = smov %s1065_s15 }
 0x3a0   : > { %s1250_s9 = smov %s1053_s12  ;;  %16 = sbr.rel (!%p14_p8) target bundleno = 5 (0x5), region = 71 }
 0x3a5   :  { %685 = vsyncpa [#allocation3], 1 }
 0x3a6   :  { %687 = vsyncpa [#allocation3 + $0x1], 1 }
 0x3a7   :  { %688 = vsyncpa [#allocation4], 1 }
 0x3a8   :  { %690 = vsyncpa [#allocation4 + $0x1], 1 }

</bundles_post_ra>
